<compile_context>
chip_gen: v7x
topology: tpu7x:2x2x1
jax: 0.10.0
libtpu: 0.0.40
codegen_flags: <defaults>
</compile_context>

<pallas_src>
import jax
import jax.numpy as jnp
import numpy as np
from jax.experimental import pallas as pl
from jax.experimental.pallas import tpu as pltpu


def _bottleneck_kernel(x_ref, w1_ref, b1_ref, w2_ref, b2_ref, w3_ref, b3_ref,
                       out_ref, pad_ref):
    # x_ref: (B, H, W, Cin) block of B batch elements.
    B, H, W, Cin = x_ref.shape
    P = w1_ref.shape[1]            # planes
    Cout = w3_ref.shape[1]         # planes * expansion (== Cin here)
    M = B * H * W

    # ---- conv1 (1x1, BN scale pre-folded into w1) + bias + ReLU ------------
    x_bf = x_ref[...].reshape(M, Cin).astype(jnp.bfloat16)
    y1 = jnp.dot(x_bf, w1_ref[...], preferred_element_type=jnp.float32)
    y1 = jnp.maximum(y1 + b1_ref[...], 0.0)                    # (M, P) f32

    # ---- conv2 (3x3, pad=1, stride=1) + bias + ReLU ------------------------
    # Zero ONLY the 1-pixel border of the padded scratch (interior is fully
    # overwritten below).  Done per step (cheap) so it stays correct when the
    # parallel batch axis is split across TensorCores (scratch starts as
    # garbage on each core).
    pad_ref[:, 0:1, :, :] = jnp.zeros((B, 1, W + 2, P), jnp.float32)
    pad_ref[:, H + 1:H + 2, :, :] = jnp.zeros((B, 1, W + 2, P), jnp.float32)
    pad_ref[:, :, 0:1, :] = jnp.zeros((B, H + 2, 1, P), jnp.float32)
    pad_ref[:, :, W + 1:W + 2, :] = jnp.zeros((B, H + 2, 1, P), jnp.float32)
    pad_ref[:, 1:H + 1, 1:W + 1, :] = y1.reshape(B, H, W, P)

    def tap(dy, dx):
        patch = pad_ref[:, dy:dy + H, dx:dx + W, :].reshape(M, P)
        return jnp.dot(patch.astype(jnp.bfloat16), w2_ref[dy, dx],
                       preferred_element_type=jnp.float32)

    acc = tap(0, 0)                          # init from first tap (no zeros+add)
    for dy in range(3):
        for dx in range(3):
            if dy == 0 and dx == 0:
                continue
            acc = acc + tap(dy, dx)
    y2 = jnp.maximum(acc + b2_ref[...], 0.0).astype(jnp.bfloat16)   # (M, P)

    # ---- conv3 (1x1) + bias + residual add + ReLU --------------------------
    y3 = jnp.dot(y2, w3_ref[...], preferred_element_type=jnp.float32)
    y3 = y3 + b3_ref[...]
    res = x_ref[...].reshape(M, Cout)        # re-read residual in f32
    out = jnp.maximum(y3 + res, 0.0)
    out_ref[...] = out.reshape(B, H, W, Cout).astype(out_ref.dtype)


def _pick_batch_tile(n, h, w, target_rows=256):
    """Largest divisor of n whose rows (b*h*w) fit an MXU-friendly target,
    preferring >= 2 grid steps so dual-TensorCore chips keep both cores busy."""
    divisors = [b for b in range(1, n + 1) if n % b == 0]
    fitting = [b for b in divisors if b * h * w <= max(target_rows, h * w)]
    two_step = [b for b in fitting if n // b >= 2]
    cands = two_step or fitting or [1]
    return max(cands)


def bottleneck_pallas(x_nchw, params):
    """x_nchw: (N, C, H, W) float32; params: dict with BN folded into weights."""
    # TODO(synk): keep the surrounding model NHWC end-to-end to avoid these
    # two HBM round-trip transposes (kept only to match the NCHW convention).
    x = jnp.transpose(x_nchw, (0, 2, 3, 1))        # NCHW -> NHWC
    N, H, W, Cin = x.shape
    P = params["w1"].shape[1]
    Cout = params["w3"].shape[1]
    assert Cout == Cin, "default Bottleneck (no downsample) needs Cin == 4*planes"

    bt = _pick_batch_tile(N, H, W)
    grid = (N // bt,)

    full = lambda shape: pl.BlockSpec(shape, lambda n: (0,) * len(shape))

    out_nhwc = pl.pallas_call(
        _bottleneck_kernel,
        out_shape=jax.ShapeDtypeStruct((N, H, W, Cout), x.dtype),
        grid=grid,
        in_specs=[
            pl.BlockSpec((bt, H, W, Cin), lambda n: (n, 0, 0, 0)),   # x
            full((Cin, P)), full((1, P)),                            # conv1 (BN folded)
            full((3, 3, P, P)), full((1, P)),                        # conv2 (BN folded)
            full((P, Cout)), full((1, Cout)),                        # conv3 (BN folded)
        ],
        out_specs=pl.BlockSpec((bt, H, W, Cout), lambda n: (n, 0, 0, 0)),
        scratch_shapes=[pltpu.VMEM((bt, H + 2, W + 2, P), jnp.float32)],
        compiler_params=pltpu.CompilerParams(
            dimension_semantics=("parallel",),
            vmem_limit_bytes=32 * 1024 * 1024),
    )(x,
      params["w1"], params["b1"],
      params["w2"], params["b2"],
      params["w3"], params["b3"])

    return jnp.transpose(out_nhwc, (0, 3, 1, 2))   # NHWC -> NCHW


def _fold_bn(gamma, beta, mean, var, eps=1e-5):
    scale = gamma / jnp.sqrt(var + eps)
    bias = beta - mean * scale
    return scale, bias


def make_params(key, inplanes, planes):
    """Deterministic synthetic parameters matching Bottleneck.__init__ shapes.

    BN scale is folded into the conv weights (inference semantics); matmul
    weights are stored in bf16 for full-rate MXU, biases stay f32.
    """
    exp = 4
    keys = jax.random.split(key, 16)
    k = iter(keys)

    def conv_w(shape, kk):           # small-variance init
        return jax.random.normal(kk, shape, jnp.float32) * 0.1

    def bn_stats(c, k0, k1, k2, k3):
        gamma = 1.0 + 0.2 * jax.random.normal(k0, (c,), jnp.float32)
        beta = 0.1 * jax.random.normal(k1, (c,), jnp.float32)
        mean = 0.1 * jax.random.normal(k2, (c,), jnp.float32)
        var = jax.random.uniform(k3, (c,), jnp.float32, minval=0.5, maxval=1.5)
        return _fold_bn(gamma, beta, mean, var)

    # weights in matmul layout: (Cin, Cout) / (kh, kw, Cin, Cout)
    w1f = conv_w((inplanes, planes), next(k))                 # conv1x1
    s1, b1 = bn_stats(planes, next(k), next(k), next(k), next(k))
    w2f = conv_w((3, 3, planes, planes), next(k))             # conv3x3
    s2, b2 = bn_stats(planes, next(k), next(k), next(k), next(k))
    w3f = conv_w((planes, planes * exp), next(k))             # conv1x1
    s3, b3 = bn_stats(planes * exp, next(k), next(k), next(k), next(k))

    return dict(
        w1=(w1f * s1[None, :]).astype(jnp.bfloat16), b1=b1[None, :],
        w2=(w2f * s2[None, None, None, :]).astype(jnp.bfloat16), b2=b2[None, :],
        w3=(w3f * s3[None, :]).astype(jnp.bfloat16), b3=b3[None, :],
    )


def bottleneck_ref(x_nchw, p):
    """Pure-JAX reference mirroring the kernel numerics (bf16 matmul inputs,
    f32 accumulation, BN already folded into weights)."""
    x = jnp.transpose(x_nchw, (0, 2, 3, 1))  # NHWC

    def conv(h, w, pad):
        return jax.lax.conv_general_dilated(
            h.astype(jnp.bfloat16), w.astype(jnp.bfloat16),
            window_strides=(1, 1), padding=pad,
            dimension_numbers=("NHWC", "HWIO", "NHWC"),
            preferred_element_type=jnp.float32)

    y = conv(x, p["w1"][None, None], "VALID")
    y = jnp.maximum(y + p["b1"][0], 0.0)
    y = conv(y, p["w2"], [(1, 1), (1, 1)])
    y = jnp.maximum(y + p["b2"][0], 0.0)
    y = conv(y, p["w3"][None, None], "VALID")
    y = y + p["b3"][0]
    y = jnp.maximum(y + x, 0.0)
    return jnp.transpose(y, (0, 3, 1, 2))


if __name__ == "__main__":
    key = jax.random.PRNGKey(0)
    k_x, k_p = jax.random.split(key)

    # small shapes consistent with Bottleneck: inplanes = planes * expansion
    N, planes, H, W = 2, 4, 8, 8
    inplanes = planes * 4                      # 16
    x = jax.random.normal(k_x, (N, inplanes, H, W), jnp.float32)
    params = make_params(k_p, inplanes, planes)

    out = jax.block_until_ready(bottleneck_pallas(x, params))
    ref = jax.block_until_ready(bottleneck_ref(x, params))

    assert out.shape == (N, inplanes, H, W)
    # bf16 matmul inputs on both sides -> compare at bf16-appropriate tolerance
    np.testing.assert_allclose(np.asarray(out), np.asarray(ref),
                               rtol=1e-2, atol=1e-2)
    print("KERNEL_OK")
</pallas_src>

<mosaic_0001>
module attributes {stable_mosaic.version = 11 : i64} {
  func.func @_bottleneck_kernel(%arg0: i32, %arg1: memref<1x8x8x16xf32, #tpu.memory_space<vmem>>, %arg2: memref<16x4xbf16, #tpu.memory_space<vmem>>, %arg3: memref<1x4xf32, #tpu.memory_space<vmem>>, %arg4: memref<3x3x4x4xbf16, #tpu.memory_space<vmem>>, %arg5: memref<1x4xf32, #tpu.memory_space<vmem>>, %arg6: memref<4x16xbf16, #tpu.memory_space<vmem>>, %arg7: memref<1x16xf32, #tpu.memory_space<vmem>>, %arg8: memref<1x8x8x16xf32, #tpu.memory_space<vmem>>, %arg9: memref<1x10x10x4xf32, #tpu.memory_space<vmem>>) attributes {dimension_semantics = [#tpu.dimension_semantics<parallel>], iteration_bounds = array<i64: 2>, scalar_prefetch = 0 : i64, scratch_operands = 1 : i64, tpu.core_type = #tpu.core_type<tc>, window_params = [{transform_indices = @transform_0, window_bounds = array<i64: 1, 8, 8, 16>}, {pipeline_mode = #tpu.pipeline_mode<synchronous>, transform_indices = @transform_1, window_bounds = array<i64: 16, 4>}, {pipeline_mode = #tpu.pipeline_mode<synchronous>, transform_indices = @transform_2, window_bounds = array<i64: 1, 4>}, {pipeline_mode = #tpu.pipeline_mode<synchronous>, transform_indices = @transform_3, window_bounds = array<i64: 3, 3, 4, 4>}, {pipeline_mode = #tpu.pipeline_mode<synchronous>, transform_indices = @transform_4, window_bounds = array<i64: 1, 4>}, {pipeline_mode = #tpu.pipeline_mode<synchronous>, transform_indices = @transform_5, window_bounds = array<i64: 4, 16>}, {pipeline_mode = #tpu.pipeline_mode<synchronous>, transform_indices = @transform_6, window_bounds = array<i64: 1, 16>}, {transform_indices = @transform_7, window_bounds = array<i64: 1, 8, 8, 16>}]} {
    %c0 = arith.constant 0 : index
    %c0_0 = arith.constant 0 : index
    %c0_1 = arith.constant 0 : index
    %c0_2 = arith.constant 0 : index
    %0 = vector.load %arg1[%c0, %c0_0, %c0_1, %c0_2] : memref<1x8x8x16xf32, #tpu.memory_space<vmem>>, vector<1x8x8x16xf32>
    %1 = vector.shape_cast %0 : vector<1x8x8x16xf32> to vector<64x16xf32>
    %2 = arith.truncf %1 : vector<64x16xf32> to vector<64x16xbf16>
    %c0_3 = arith.constant 0 : index
    %c0_4 = arith.constant 0 : index
    %3 = vector.load %arg2[%c0_3, %c0_4] : memref<16x4xbf16, #tpu.memory_space<vmem>>, vector<16x4xbf16>
    %cst = arith.constant dense<0.000000e+00> : vector<64x4xf32>
    %4 = tpu.matmul %2, %3, %cst {dimension_numbers = #tpu.dot_dimension_numbers<[1], [0], [0], [1], [0, 0, 1, 1], [], []>} : vector<64x16xbf16>, vector<16x4xbf16>, vector<64x4xf32> -> vector<64x4xf32>
    %c0_5 = arith.constant 0 : index
    %c0_6 = arith.constant 0 : index
    %5 = vector.load %arg3[%c0_5, %c0_6] : memref<1x4xf32, #tpu.memory_space<vmem>>, vector<1x4xf32>
    %6 = vector.broadcast %5 : vector<1x4xf32> to vector<64x4xf32>
    %7 = arith.addf %4, %6 : vector<64x4xf32>
    %cst_7 = arith.constant 0.000000e+00 : f32
    %8 = vector.broadcast %cst_7 : f32 to vector<64x4xf32>
    %9 = arith.maximumf %7, %8 : vector<64x4xf32>
    %cst_8 = arith.constant 0.000000e+00 : f32
    %10 = vector.broadcast %cst_8 : f32 to vector<1x1x10x4xf32>
    %c0_9 = arith.constant 0 : index
    %c0_10 = arith.constant 0 : index
    %c0_11 = arith.constant 0 : index
    %c0_12 = arith.constant 0 : index
    %11 = vector.load %arg9[%c0_9, %c0_10, %c0_11, %c0_12] : memref<1x10x10x4xf32, #tpu.memory_space<vmem>>, vector<1x1x10x4xf32>
    tpu.vector_store %arg9[%c0_9, %c0_10, %c0_11, %c0_12], %10 {strides = array<i32>} : memref<1x10x10x4xf32, #tpu.memory_space<vmem>>, vector<1x1x10x4xf32>,
    %cst_13 = arith.constant 0.000000e+00 : f32
    %12 = vector.broadcast %cst_13 : f32 to vector<1x1x10x4xf32>
    %c0_14 = arith.constant 0 : index
    %c9 = arith.constant 9 : index
    %c0_15 = arith.constant 0 : index
    %c0_16 = arith.constant 0 : index
    %13 = vector.load %arg9[%c0_14, %c9, %c0_15, %c0_16] : memref<1x10x10x4xf32, #tpu.memory_space<vmem>>, vector<1x1x10x4xf32>
    tpu.vector_store %arg9[%c0_14, %c9, %c0_15, %c0_16], %12 {strides = array<i32>} : memref<1x10x10x4xf32, #tpu.memory_space<vmem>>, vector<1x1x10x4xf32>,
    %cst_17 = arith.constant 0.000000e+00 : f32
    %14 = vector.broadcast %cst_17 : f32 to vector<1x10x1x4xf32>
    %c0_18 = arith.constant 0 : index
    %c0_19 = arith.constant 0 : index
    %c0_20 = arith.constant 0 : index
    %c0_21 = arith.constant 0 : index
    %15 = vector.load %arg9[%c0_18, %c0_19, %c0_20, %c0_21] : memref<1x10x10x4xf32, #tpu.memory_space<vmem>>, vector<1x10x1x4xf32>
    tpu.vector_store %arg9[%c0_18, %c0_19, %c0_20, %c0_21], %14 {strides = array<i32>} : memref<1x10x10x4xf32, #tpu.memory_space<vmem>>, vector<1x10x1x4xf32>,
    %cst_22 = arith.constant 0.000000e+00 : f32
    %16 = vector.broadcast %cst_22 : f32 to vector<1x10x1x4xf32>
    %c0_23 = arith.constant 0 : index
    %c0_24 = arith.constant 0 : index
    %c9_25 = arith.constant 9 : index
    %c0_26 = arith.constant 0 : index
    %17 = vector.load %arg9[%c0_23, %c0_24, %c9_25, %c0_26] : memref<1x10x10x4xf32, #tpu.memory_space<vmem>>, vector<1x10x1x4xf32>
    tpu.vector_store %arg9[%c0_23, %c0_24, %c9_25, %c0_26], %16 {strides = array<i32>} : memref<1x10x10x4xf32, #tpu.memory_space<vmem>>, vector<1x10x1x4xf32>,
    %18 = vector.shape_cast %9 : vector<64x4xf32> to vector<1x8x8x4xf32>
    %c0_27 = arith.constant 0 : index
    %c1 = arith.constant 1 : index
    %c1_28 = arith.constant 1 : index
    %c0_29 = arith.constant 0 : index
    %19 = vector.load %arg9[%c0_27, %c1, %c1_28, %c0_29] : memref<1x10x10x4xf32, #tpu.memory_space<vmem>>, vector<1x8x8x4xf32>
    tpu.vector_store %arg9[%c0_27, %c1, %c1_28, %c0_29], %18 {strides = array<i32>} : memref<1x10x10x4xf32, #tpu.memory_space<vmem>>, vector<1x8x8x4xf32>,
    %c0_30 = arith.constant 0 : index
    %c0_31 = arith.constant 0 : index
    %c0_32 = arith.constant 0 : index
    %c0_33 = arith.constant 0 : index
    %20 = vector.load %arg9[%c0_30, %c0_31, %c0_32, %c0_33] : memref<1x10x10x4xf32, #tpu.memory_space<vmem>>, vector<1x8x8x4xf32>
    %21 = vector.shape_cast %20 : vector<1x8x8x4xf32> to vector<64x4xf32>
    %22 = arith.truncf %21 : vector<64x4xf32> to vector<64x4xbf16>
    %c0_34 = arith.constant 0 : index
    %c0_35 = arith.constant 0 : index
    %c0_36 = arith.constant 0 : index
    %c0_37 = arith.constant 0 : index
    %23 = vector.load %arg4[%c0_34, %c0_35, %c0_36, %c0_37] : memref<3x3x4x4xbf16, #tpu.memory_space<vmem>>, vector<1x1x4x4xbf16>
    %24 = vector.shape_cast %23 : vector<1x1x4x4xbf16> to vector<4x4xbf16>
    %cst_38 = arith.constant dense<0.000000e+00> : vector<64x4xf32>
    %25 = tpu.matmul %22, %24, %cst_38 {dimension_numbers = #tpu.dot_dimension_numbers<[1], [0], [0], [1], [0, 0, 1, 1], [], []>} : vector<64x4xbf16>, vector<4x4xbf16>, vector<64x4xf32> -> vector<64x4xf32>
    %c0_39 = arith.constant 0 : index
    %c0_40 = arith.constant 0 : index
    %c1_41 = arith.constant 1 : index
    %c0_42 = arith.constant 0 : index
    %26 = vector.load %arg9[%c0_39, %c0_40, %c1_41, %c0_42] : memref<1x10x10x4xf32, #tpu.memory_space<vmem>>, vector<1x8x8x4xf32>
    %27 = vector.shape_cast %26 : vector<1x8x8x4xf32> to vector<64x4xf32>
    %28 = arith.truncf %27 : vector<64x4xf32> to vector<64x4xbf16>
    %c0_43 = arith.constant 0 : index
    %c1_44 = arith.constant 1 : index
    %c0_45 = arith.constant 0 : index
    %c0_46 = arith.constant 0 : index
    %29 = vector.load %arg4[%c0_43, %c1_44, %c0_45, %c0_46] : memref<3x3x4x4xbf16, #tpu.memory_space<vmem>>, vector<1x1x4x4xbf16>
    %30 = vector.shape_cast %29 : vector<1x1x4x4xbf16> to vector<4x4xbf16>
    %cst_47 = arith.constant dense<0.000000e+00> : vector<64x4xf32>
    %31 = tpu.matmul %28, %30, %cst_47 {dimension_numbers = #tpu.dot_dimension_numbers<[1], [0], [0], [1], [0, 0, 1, 1], [], []>} : vector<64x4xbf16>, vector<4x4xbf16>, vector<64x4xf32> -> vector<64x4xf32>
    %32 = arith.addf %25, %31 : vector<64x4xf32>
    %c0_48 = arith.constant 0 : index
    %c0_49 = arith.constant 0 : index
    %c2 = arith.constant 2 : index
    %c0_50 = arith.constant 0 : index
    %33 = vector.load %arg9[%c0_48, %c0_49, %c2, %c0_50] : memref<1x10x10x4xf32, #tpu.memory_space<vmem>>, vector<1x8x8x4xf32>
    %34 = vector.shape_cast %33 : vector<1x8x8x4xf32> to vector<64x4xf32>
    %35 = arith.truncf %34 : vector<64x4xf32> to vector<64x4xbf16>
    %c0_51 = arith.constant 0 : index
    %c2_52 = arith.constant 2 : index
    %c0_53 = arith.constant 0 : index
    %c0_54 = arith.constant 0 : index
    %36 = vector.load %arg4[%c0_51, %c2_52, %c0_53, %c0_54] : memref<3x3x4x4xbf16, #tpu.memory_space<vmem>>, vector<1x1x4x4xbf16>
    %37 = vector.shape_cast %36 : vector<1x1x4x4xbf16> to vector<4x4xbf16>
    %cst_55 = arith.constant dense<0.000000e+00> : vector<64x4xf32>
    %38 = tpu.matmul %35, %37, %cst_55 {dimension_numbers = #tpu.dot_dimension_numbers<[1], [0], [0], [1], [0, 0, 1, 1], [], []>} : vector<64x4xbf16>, vector<4x4xbf16>, vector<64x4xf32> -> vector<64x4xf32>
    %39 = arith.addf %32, %38 : vector<64x4xf32>
    %c0_56 = arith.constant 0 : index
    %c1_57 = arith.constant 1 : index
    %c0_58 = arith.constant 0 : index
    %c0_59 = arith.constant 0 : index
    %40 = vector.load %arg9[%c0_56, %c1_57, %c0_58, %c0_59] : memref<1x10x10x4xf32, #tpu.memory_space<vmem>>, vector<1x8x8x4xf32>
    %41 = vector.shape_cast %40 : vector<1x8x8x4xf32> to vector<64x4xf32>
    %42 = arith.truncf %41 : vector<64x4xf32> to vector<64x4xbf16>
    %c1_60 = arith.constant 1 : index
    %c0_61 = arith.constant 0 : index
    %c0_62 = arith.constant 0 : index
    %c0_63 = arith.constant 0 : index
    %43 = vector.load %arg4[%c1_60, %c0_61, %c0_62, %c0_63] : memref<3x3x4x4xbf16, #tpu.memory_space<vmem>>, vector<1x1x4x4xbf16>
    %44 = vector.shape_cast %43 : vector<1x1x4x4xbf16> to vector<4x4xbf16>
    %cst_64 = arith.constant dense<0.000000e+00> : vector<64x4xf32>
    %45 = tpu.matmul %42, %44, %cst_64 {dimension_numbers = #tpu.dot_dimension_numbers<[1], [0], [0], [1], [0, 0, 1, 1], [], []>} : vector<64x4xbf16>, vector<4x4xbf16>, vector<64x4xf32> -> vector<64x4xf32>
    %46 = arith.addf %39, %45 : vector<64x4xf32>
    %c0_65 = arith.constant 0 : index
    %c1_66 = arith.constant 1 : index
    %c1_67 = arith.constant 1 : index
    %c0_68 = arith.constant 0 : index
    %47 = vector.load %arg9[%c0_65, %c1_66, %c1_67, %c0_68] : memref<1x10x10x4xf32, #tpu.memory_space<vmem>>, vector<1x8x8x4xf32>
    %48 = vector.shape_cast %47 : vector<1x8x8x4xf32> to vector<64x4xf32>
    %49 = arith.truncf %48 : vector<64x4xf32> to vector<64x4xbf16>
    %c1_69 = arith.constant 1 : index
    %c1_70 = arith.constant 1 : index
    %c0_71 = arith.constant 0 : index
    %c0_72 = arith.constant 0 : index
    %50 = vector.load %arg4[%c1_69, %c1_70, %c0_71, %c0_72] : memref<3x3x4x4xbf16, #tpu.memory_space<vmem>>, vector<1x1x4x4xbf16>
    %51 = vector.shape_cast %50 : vector<1x1x4x4xbf16> to vector<4x4xbf16>
    %cst_73 = arith.constant dense<0.000000e+00> : vector<64x4xf32>
    %52 = tpu.matmul %49, %51, %cst_73 {dimension_numbers = #tpu.dot_dimension_numbers<[1], [0], [0], [1], [0, 0, 1, 1], [], []>} : vector<64x4xbf16>, vector<4x4xbf16>, vector<64x4xf32> -> vector<64x4xf32>
    %53 = arith.addf %46, %52 : vector<64x4xf32>
    %c0_74 = arith.constant 0 : index
    %c1_75 = arith.constant 1 : index
    %c2_76 = arith.constant 2 : index
    %c0_77 = arith.constant 0 : index
    %54 = vector.load %arg9[%c0_74, %c1_75, %c2_76, %c0_77] : memref<1x10x10x4xf32, #tpu.memory_space<vmem>>, vector<1x8x8x4xf32>
    %55 = vector.shape_cast %54 : vector<1x8x8x4xf32> to vector<64x4xf32>
    %56 = arith.truncf %55 : vector<64x4xf32> to vector<64x4xbf16>
    %c1_78 = arith.constant 1 : index
    %c2_79 = arith.constant 2 : index
    %c0_80 = arith.constant 0 : index
    %c0_81 = arith.constant 0 : index
    %57 = vector.load %arg4[%c1_78, %c2_79, %c0_80, %c0_81] : memref<3x3x4x4xbf16, #tpu.memory_space<vmem>>, vector<1x1x4x4xbf16>
    %58 = vector.shape_cast %57 : vector<1x1x4x4xbf16> to vector<4x4xbf16>
    %cst_82 = arith.constant dense<0.000000e+00> : vector<64x4xf32>
    %59 = tpu.matmul %56, %58, %cst_82 {dimension_numbers = #tpu.dot_dimension_numbers<[1], [0], [0], [1], [0, 0, 1, 1], [], []>} : vector<64x4xbf16>, vector<4x4xbf16>, vector<64x4xf32> -> vector<64x4xf32>
    %60 = arith.addf %53, %59 : vector<64x4xf32>
    %c0_83 = arith.constant 0 : index
    %c2_84 = arith.constant 2 : index
    %c0_85 = arith.constant 0 : index
    %c0_86 = arith.constant 0 : index
    %61 = vector.load %arg9[%c0_83, %c2_84, %c0_85, %c0_86] : memref<1x10x10x4xf32, #tpu.memory_space<vmem>>, vector<1x8x8x4xf32>
    %62 = vector.shape_cast %61 : vector<1x8x8x4xf32> to vector<64x4xf32>
    %63 = arith.truncf %62 : vector<64x4xf32> to vector<64x4xbf16>
    %c2_87 = arith.constant 2 : index
    %c0_88 = arith.constant 0 : index
    %c0_89 = arith.constant 0 : index
    %c0_90 = arith.constant 0 : index
    %64 = vector.load %arg4[%c2_87, %c0_88, %c0_89, %c0_90] : memref<3x3x4x4xbf16, #tpu.memory_space<vmem>>, vector<1x1x4x4xbf16>
    %65 = vector.shape_cast %64 : vector<1x1x4x4xbf16> to vector<4x4xbf16>
    %cst_91 = arith.constant dense<0.000000e+00> : vector<64x4xf32>
    %66 = tpu.matmul %63, %65, %cst_91 {dimension_numbers = #tpu.dot_dimension_numbers<[1], [0], [0], [1], [0, 0, 1, 1], [], []>} : vector<64x4xbf16>, vector<4x4xbf16>, vector<64x4xf32> -> vector<64x4xf32>
    %67 = arith.addf %60, %66 : vector<64x4xf32>
    %c0_92 = arith.constant 0 : index
    %c2_93 = arith.constant 2 : index
    %c1_94 = arith.constant 1 : index
    %c0_95 = arith.constant 0 : index
    %68 = vector.load %arg9[%c0_92, %c2_93, %c1_94, %c0_95] : memref<1x10x10x4xf32, #tpu.memory_space<vmem>>, vector<1x8x8x4xf32>
    %69 = vector.shape_cast %68 : vector<1x8x8x4xf32> to vector<64x4xf32>
    %70 = arith.truncf %69 : vector<64x4xf32> to vector<64x4xbf16>
    %c2_96 = arith.constant 2 : index
    %c1_97 = arith.constant 1 : index
    %c0_98 = arith.constant 0 : index
    %c0_99 = arith.constant 0 : index
    %71 = vector.load %arg4[%c2_96, %c1_97, %c0_98, %c0_99] : memref<3x3x4x4xbf16, #tpu.memory_space<vmem>>, vector<1x1x4x4xbf16>
    %72 = vector.shape_cast %71 : vector<1x1x4x4xbf16> to vector<4x4xbf16>
    %cst_100 = arith.constant dense<0.000000e+00> : vector<64x4xf32>
    %73 = tpu.matmul %70, %72, %cst_100 {dimension_numbers = #tpu.dot_dimension_numbers<[1], [0], [0], [1], [0, 0, 1, 1], [], []>} : vector<64x4xbf16>, vector<4x4xbf16>, vector<64x4xf32> -> vector<64x4xf32>
    %74 = arith.addf %67, %73 : vector<64x4xf32>
    %c0_101 = arith.constant 0 : index
    %c2_102 = arith.constant 2 : index
    %c2_103 = arith.constant 2 : index
    %c0_104 = arith.constant 0 : index
    %75 = vector.load %arg9[%c0_101, %c2_102, %c2_103, %c0_104] : memref<1x10x10x4xf32, #tpu.memory_space<vmem>>, vector<1x8x8x4xf32>
    %76 = vector.shape_cast %75 : vector<1x8x8x4xf32> to vector<64x4xf32>
    %77 = arith.truncf %76 : vector<64x4xf32> to vector<64x4xbf16>
    %c2_105 = arith.constant 2 : index
    %c2_106 = arith.constant 2 : index
    %c0_107 = arith.constant 0 : index
    %c0_108 = arith.constant 0 : index
    %78 = vector.load %arg4[%c2_105, %c2_106, %c0_107, %c0_108] : memref<3x3x4x4xbf16, #tpu.memory_space<vmem>>, vector<1x1x4x4xbf16>
    %79 = vector.shape_cast %78 : vector<1x1x4x4xbf16> to vector<4x4xbf16>
    %cst_109 = arith.constant dense<0.000000e+00> : vector<64x4xf32>
    %80 = tpu.matmul %77, %79, %cst_109 {dimension_numbers = #tpu.dot_dimension_numbers<[1], [0], [0], [1], [0, 0, 1, 1], [], []>} : vector<64x4xbf16>, vector<4x4xbf16>, vector<64x4xf32> -> vector<64x4xf32>
    %81 = arith.addf %74, %80 : vector<64x4xf32>
    %c0_110 = arith.constant 0 : index
    %c0_111 = arith.constant 0 : index
    %82 = vector.load %arg5[%c0_110, %c0_111] : memref<1x4xf32, #tpu.memory_space<vmem>>, vector<1x4xf32>
    %83 = vector.broadcast %82 : vector<1x4xf32> to vector<64x4xf32>
    %84 = arith.addf %81, %83 : vector<64x4xf32>
    %cst_112 = arith.constant 0.000000e+00 : f32
    %85 = vector.broadcast %cst_112 : f32 to vector<64x4xf32>
    %86 = arith.maximumf %84, %85 : vector<64x4xf32>
    %87 = arith.truncf %86 : vector<64x4xf32> to vector<64x4xbf16>
    %c0_113 = arith.constant 0 : index
    %c0_114 = arith.constant 0 : index
    %88 = vector.load %arg6[%c0_113, %c0_114] : memref<4x16xbf16, #tpu.memory_space<vmem>>, vector<4x16xbf16>
    %cst_115 = arith.constant dense<0.000000e+00> : vector<64x16xf32>
    %89 = tpu.matmul %87, %88, %cst_115 {dimension_numbers = #tpu.dot_dimension_numbers<[1], [0], [0], [1], [0, 0, 1, 1], [], []>} : vector<64x4xbf16>, vector<4x16xbf16>, vector<64x16xf32> -> vector<64x16xf32>
    %c0_116 = arith.constant 0 : index
    %c0_117 = arith.constant 0 : index
    %90 = vector.load %arg7[%c0_116, %c0_117] : memref<1x16xf32, #tpu.memory_space<vmem>>, vector<1x16xf32>
    %91 = vector.broadcast %90 : vector<1x16xf32> to vector<64x16xf32>
    %92 = arith.addf %89, %91 : vector<64x16xf32>
    %c0_118 = arith.constant 0 : index
    %c0_119 = arith.constant 0 : index
    %c0_120 = arith.constant 0 : index
    %c0_121 = arith.constant 0 : index
    %93 = vector.load %arg1[%c0_118, %c0_119, %c0_120, %c0_121] : memref<1x8x8x16xf32, #tpu.memory_space<vmem>>, vector<1x8x8x16xf32>
    %94 = vector.shape_cast %93 : vector<1x8x8x16xf32> to vector<64x16xf32>
    %95 = arith.addf %92, %94 : vector<64x16xf32>
    %cst_122 = arith.constant 0.000000e+00 : f32
    %96 = vector.broadcast %cst_122 : f32 to vector<64x16xf32>
    %97 = arith.maximumf %95, %96 : vector<64x16xf32>
    %98 = vector.shape_cast %97 : vector<64x16xf32> to vector<1x8x8x16xf32>
    %c0_123 = arith.constant 0 : index
    %c0_124 = arith.constant 0 : index
    %c0_125 = arith.constant 0 : index
    %c0_126 = arith.constant 0 : index
    %99 = vector.load %arg8[%c0_123, %c0_124, %c0_125, %c0_126] : memref<1x8x8x16xf32, #tpu.memory_space<vmem>>, vector<1x8x8x16xf32>
    tpu.vector_store %arg8[%c0_123, %c0_124, %c0_125, %c0_126], %98 {strides = array<i32>} : memref<1x8x8x16xf32, #tpu.memory_space<vmem>>, vector<1x8x8x16xf32>,
    return
  }
  func.func @transform_0(%arg0: i32) -> (i32, i32, i32, i32) {
    %c0_i32 = arith.constant 0 : i32
    %c0_i32_0 = arith.constant 0 : i32
    %c0_i32_1 = arith.constant 0 : i32
    %c0_i32_2 = arith.constant 0 : i32
    return %arg0, %c0_i32, %c0_i32_0, %c0_i32_1 : i32, i32, i32, i32
  }
  func.func @transform_1(%arg0: i32) -> (i32, i32) {
    %c0_i32 = arith.constant 0 : i32
    %c0_i32_0 = arith.constant 0 : i32
    %c0_i32_1 = arith.constant 0 : i32
    return %c0_i32, %c0_i32_0 : i32, i32
  }
  func.func @transform_2(%arg0: i32) -> (i32, i32) {
    %c0_i32 = arith.constant 0 : i32
    %c0_i32_0 = arith.constant 0 : i32
    %c0_i32_1 = arith.constant 0 : i32
    return %c0_i32, %c0_i32_0 : i32, i32
  }
  func.func @transform_3(%arg0: i32) -> (i32, i32, i32, i32) {
    %c0_i32 = arith.constant 0 : i32
    %c0_i32_0 = arith.constant 0 : i32
    %c0_i32_1 = arith.constant 0 : i32
    %c0_i32_2 = arith.constant 0 : i32
    %c0_i32_3 = arith.constant 0 : i32
    return %c0_i32, %c0_i32_0, %c0_i32_1, %c0_i32_2 : i32, i32, i32, i32
  }
  func.func @transform_4(%arg0: i32) -> (i32, i32) {
    %c0_i32 = arith.constant 0 : i32
    %c0_i32_0 = arith.constant 0 : i32
    %c0_i32_1 = arith.constant 0 : i32
    return %c0_i32, %c0_i32_0 : i32, i32
  }
  func.func @transform_5(%arg0: i32) -> (i32, i32) {
    %c0_i32 = arith.constant 0 : i32
    %c0_i32_0 = arith.constant 0 : i32
    %c0_i32_1 = arith.constant 0 : i32
    return %c0_i32, %c0_i32_0 : i32, i32
  }
  func.func @transform_6(%arg0: i32) -> (i32, i32) {
    %c0_i32 = arith.constant 0 : i32
    %c0_i32_0 = arith.constant 0 : i32
    %c0_i32_1 = arith.constant 0 : i32
    return %c0_i32, %c0_i32_0 : i32, i32
  }
  func.func @transform_7(%arg0: i32) -> (i32, i32, i32, i32) {
    %c0_i32 = arith.constant 0 : i32
    %c0_i32_0 = arith.constant 0 : i32
    %c0_i32_1 = arith.constant 0 : i32
    %c0_i32_2 = arith.constant 0 : i32
    return %arg0, %c0_i32, %c0_i32_0, %c0_i32_1 : i32, i32, i32, i32
  }
}

</mosaic_0001>

<bundles_post_ra>
// kernel: tpu_custom_call.1
= control target key start
LH: loop header
LB: loop body
LE: loop exit
PB: predicated region body
PF: predicated region fallthrough
CT: control target
= control target key end

     0   :  { %12 = vsyncpa [#allocation4], 0  ;;  %s2472_s0 = inlined_call_operand.hbm [shape: f32[2,8,8,16], index: 0, kind: input, shape index: {}]   ;;  %s2473_s1 = inlined_call_operand.vmem [shape: bf16[16,4], index: 1, kind: input, shape index: {}]   ;;  %s2474_s2 = inlined_call_operand.vmem [shape: f32[1,4], index: 2, kind: input, shape index: {}]   ;;  %s2475_s3 = inlined_call_operand.vmem [shape: bf16[3,3,4,4], index: 3, kind: input, shape index: {}]   ;;  %s2476_s4 = inlined_call_operand.vmem [shape: f32[1,4], index: 4, kind: input, shape index: {}]   ;;  %s2477_s5 = inlined_call_operand.vmem [shape: bf16[4,16], index: 5, kind: input, shape index: {}]   ;;  %s2478_s6 = inlined_call_operand.vmem [shape: f32[1,16], index: 6, kind: input, shape index: {}]   ;;  %s2479_s7 = inlined_call_operand.hbm [shape: f32[2,8,8,16], index: 7, kind: output, shape index: {}]  }
   0x1   :  { %14 = vsyncpa [#allocation4 + $0x1], 0 }
   0x2   :  { %15 = vsyncpa [#allocation5], 0 }
   0x3   :  { %17 = vsyncpa [#allocation5 + $0x1], 0  ;;  %s2096_s24 = smov 0   ;;  %s2098_s25 = smov 0  }
   0x4   :  { %s2100_s26 = smov 0   ;;  %s2102_s27 = smov 0  }
   0x5 LB: > { %s2117_s28 = sadd.s32 4294967295, %s2047_s27   ;;  %s1585_s29 = sadd.s32 4294967294, %s2047_s27   ;;  %s2047_s27 = sphi %s2102_s27, %s2492_s27   ;;  %s2043_s26 = sphi %s2100_s26, %s2491_s26   ;;  %s2039_s25 = sphi %s2098_s25, %s2490_s25   ;;  %s2035_s24 = sphi %s2096_s24, %s2489_s24  }
   0x6   : > { %s2121_s30 = sadd.s32 1, %s2047_s27   ;;  %s30_s8 = sadd.s32 1, %s2043_s26 }
   0x7   : > { %s27_s9 = ssub.s32 %s2047_s27, %s2121_s30  ;;  %p37_p0 = scmp.ne.s32.totalorder %s2043_s26, %s2039_s25 }
   0x8   : > { %p28_p1 = scmp.eq.s32.totalorder %s27_s9, 0  ;;  %p38_p2 = scmp.eq.s32.totalorder %s2047_s27, 0 }
   0x9   : > { %p43_p3 = scmp.ne.s32.totalorder %s2039_s25, %s2035_s24  ;;  %p44_p4 = scmp.eq.s32.totalorder %s2117_s28, 0 }
   0xa   : > { %s2133_s10 = scalar_select %p28_p1, %s2043_s26, %s30_s8  }
   0xb   : > { %p2135_p5 = por %p38_p2, %p37_p0  ;;  %p2139_p6 = por %p44_p4, %p43_p3 }
   0xc   : > { %p193_p7 = scmp.eq.s32.totalorder %s2117_s28, 1  ;;  %p199_p8 = scmp.eq.s32.totalorder %s1585_s29, 1 }
   0xd   : > { %p1911_p10 = scmp.lt.s32.totalorder %s2047_s27, 2  ;;  %s237_s15 = sand.u32 1, %s2043_s26  }
   0xe   : > { %p2146_p11 = por %p193_p7, %p37_p0  ;;  %p2150_p12 = por %p199_p8, %p43_p3 }
   0xf   : > { %s1655_s16 = sshll.u32 %s2047_s27, 10  ;;  %s1588_s17 = sshll.u32 %s237_s15, 6 }
  0x10   : > { %s2483_s13 = scalar_select %p2146_p11, 1, 0 }
  0x11   : > { %s2484_s14 = scalar_select %p2150_p12, 1, 0 }
  0x12   : > { %s2159_s20 = scalar_lea.hbm %s2472_s0, %s1655_s16  ;;  %s241_s21 = scalar_lea.vmem [#allocation3], %s1588_s17 }
  0x13   : > { %s248_s22 = sshll.u32 %s241_s21, 4  ;;  %p2163_p13 = pnand %p1911_p10, %p2135_p5  ;;  %s2167_s22 = int_to_ptr.vmem [resolvable:$true] %s248_s22 }
  0x14   : > { %s2169_s29 = scalar_lea.sflag [#allocation4], %s237_s15  ;;  %s1951_s8 = scalar_lea.hbm %s2159_s20, 1024 }
  0x15   : > { %p1952_p0 = scmp.ne.s32.totalorder %s2159_s20, %s1951_s8  ;;  %p1953_p1 = pneg %p2163_p13 }
  0x16   : > { %s1956_s16 = scalar_lea.hbm %s2472_s0, 2048  ;;  %p1957_p4 = scmp.lt.u32.totalorder %s2159_s20, %s2472_s0 }
  0x17   : > { %p1954_p2 = pnand %p1953_p1, %p1952_p0  ;;  %p1958_p5 = scmp.lt.u32.totalorder %s1956_s16, %s1951_s8 }
  0x18   : > { %p1960_p8 = scmp.lt.u32.totalorder %s1951_s8, %s2159_s20 }
  0x19   : > { %p1955_p3 = pneg %p1954_p2  ;;  %p1959_p7 = por %p1958_p5, %p1957_p4 }
  0x1b   : > { %p1961_p10 = por %p1960_p8, %p1959_p7 }
  0x1d   : > { %p1962_p9 = pnand %p1961_p10, %p1955_p3 }
  0x1f   : > { %1965 = shalt.err (!%p1962_p9)
}
  0x20   : > { %s1966_s15 = scalar_lea.vmem %s2167_s22, 1024  ;;  %s2049_s19 = smov [#allocation3]  }
  0x21   : > { %p1967_p0 = scmp.ne.s32.totalorder %s2167_s22, %s1966_s15  ;;  %s1971_s21 = sshll.u32 %s2049_s19, 4  ;;  %s1972_s21 = int_to_ptr.vmem [resolvable:$false] %s1971_s21 }
  0x22   : > { %s1973_s9 = scalar_lea.vmem %s1972_s21, 2048  ;;  %p1974_p11 = scmp.lt.s32.totalorder %s2167_s22, %s1972_s21 }
  0x23   : > { %p1969_p2 = pnand %p1967_p0, %p1953_p1  ;;  %p1975_p4 = scmp.lt.s32.totalorder %s1973_s9, %s1966_s15 }
  0x25   : > { %p1970_p12 = pneg %p1969_p2  ;;  %p1976_p5 = por %p1975_p4, %p1974_p11 }
  0x27   : > { %p1977_p7 = pnand %p1976_p5, %p1970_p12 }
  0x29   : > { %1980 = shalt.err (!%p1977_p7)
}
  0x2a   : > { %s2050_s8 = smov 128   ;;  %s2051_s11 = smov 8  }
  0x2b   : > { %1906 = dma.hbm_to_vmem [thread:$0]  (!%p2163_p13), %s2159_s20, 1024, %s2167_s22, %s2169_s29, %s2050_s8, %s2050_s8, %s2051_s11  }
  0x2c   : > { %p1591_p9 = scmp.ge.s32.totalorder %s2047_s27, 1  ;;  %p256_p1 = scmp.lt.s32.totalorder %s2047_s27, 3 }
  0x2e   : > { %p257_p3 = pnand %p1591_p9, %p256_p1 }
  0x2f   : > { %s2200_s16 = sand.u32 (!%p257_p3), 1, %s2039_s25  }
  0x30   : > { %260 = sbr.rel (%p257_p3) target bundleno = 840 (0x348), region = 48  ;;  %s1592_s17 = sshll.u32 (!%p257_p3), %s2200_s16, 6 }
  0x31   : > { %s263_s18 = scalar_lea.sflag (!%p257_p3), [#allocation4], %s2200_s16  ;;  %s266_s15 = scalar_lea.vmem (!%p257_p3), [#allocation3], %s1592_s17 }
  0x37   : > { %2026 = dma.done.wait (%p2139_p6), %s263_s18, 1024  }
  0x38   : > { %2028 = vsyncadd (%p2139_p6), %s263_s18, 4294966272  ;;  %v1950_v0 = vld [vmem:[%s2473_s1] sm:$0xff]   ;;  %v2215_v2 = vld [vmem:[%s266_s15 + $0x8] sm:$0xff]  ;;  %vm325_vm0 = vcmask 130048   ;;  %vm411_vm1 = vcmask 31744   ;;  %vm413_vm2 = vcmask 25600  }
  0x39   : > { %v2213_v1 = vld [vmem:[%s266_s15] sm:$0xff]  ;;  %v2217_v3 = vld [vmem:[%s266_s15 + $0x10] sm:$0xff]  ;;  %1712 = vmatprep.subr.bf16.mxu0 %v1950_v0  ;;  %v2221_v5 = vld [vmem:[%s266_s15 + $0x18] sm:$0xff]  ;;  %vm418_vm3 = vcmask 24576   ;;  %v2052_v13 = vmov 0.0   ;;  %vm487_vm4 = vcmask 1041408  }
  0x3a   : > { %v306_v4 = vpack.c.bf16 %v2215_v2, %v2213_v1  ;;  %v2223_v6 = vld [vmem:[%s266_s15 + $0x20] sm:$0xff]  ;;  %v2225_v7 = vld [vmem:[%s266_s15 + $0x28] sm:$0xff]  ;;  %1713 = vmatpush3.bf16.msra.mxu0 %v1950_v0  ;;  %v307_v8 = vpack.c.bf16 %v2221_v5, %v2217_v3  ;;  %v2234_v10 = vld [vmem:[%s266_s15 + $0x30] sm:$0xff]  ;;  %412 = vst.msk [vmem:[#allocation2] sm:$0xff] %vm411_vm1, %v2052_v13  ;;  %s296_s29 = scalar_lea.vmem [#allocation6], %s1592_s17  ;;  %s1656_s17 = sshll.u32 %s2117_s28, 10 }
  0x3b   : > { %v308_v9 = vpack.c.bf16 %v2225_v7, %v2223_v6  ;;  %v2236_v11 = vld [vmem:[%s266_s15 + $0x38] sm:$0xff]  ;;  %414 = vst.msk [vmem:[#allocation2 + $0x8] sm:$0x3] %vm413_vm2, %v2052_v13  ;;  %417 = vst.msk [vmem:[#allocation2 + $0x98] sm:$0x3] %vm413_vm2, %v2052_v13  ;;  %s1512_s19 = sshll.u32 %s296_s29, 4  ;;  %s2423_s8 = scalar_lea.hbm %s2479_s7, %s1656_s17  ;;  %s2425_s19 = int_to_ptr.vmem [resolvable:$true] %s1512_s19 }
  0x3c   : > { %1714 = vmatprep.mubr.msk.bf16.mxu0 %vm325_vm0, %v306_v4  ;;  %v309_v12 = vpack.c.bf16 %v2236_v11, %v2234_v10  ;;  %416 = vst.msk [vmem:[#allocation2 + $0x90] sm:$0xff] %vm411_vm1, %v2052_v13  ;;  %v1600_v14 = vld [vmem:[%s2475_s3 + $0x2] sm:$0x3]  ;;  %v2271_v16 = vld [vmem:[%s2475_s3 + $0x6] sm:$0x3]  ;;  %s1499_s28 = scalar_lea.sflag [#allocation5], %s2200_s16 }
  0x3d   : > { %1715 = vmatmul.mubr.msk.bf16.vlgmr.msra.gmra.mrb[0].mxu0 %vm325_vm0, %v307_v8  ;;  %424 = vst.msk [vmem:[#allocation2 + $0x50] sm:$0x1] %vm418_vm3, %v2052_v13  ;;  %425 = vst.msk [vmem:[#allocation2 + $0x60] sm:$0x1] %vm418_vm3, %v2052_v13  ;;  %1888 = vmatprep.subr.msk.bf16.mxu0 %vm487_vm4, %v1600_v14  ;;  %v489_v15 = vsel %vm487_vm4, %v1600_v14, 0  ;;  %v2277_v17 = vsel %vm487_vm4, %v2271_v16, 0 }
  0x3e   : > { %1718 = vmatprep.mubr.msk.bf16.mxu0 %vm325_vm0, %v308_v9  ;;  %420 = vst.msk [vmem:[#allocation2 + $0x10] sm:$0x1] %vm418_vm3, %v2052_v13  ;;  %421 = vst.msk [vmem:[#allocation2 + $0x20] sm:$0x1] %vm418_vm3, %v2052_v13  ;;  %1723 = vmatpush3.bf16.msra.mxu0 %v489_v15  ;;  %v2283_v18 = vld [vmem:[%s2475_s3 + $0x8] sm:$0x3] }
  0x3f   : > { %422 = vst.msk [vmem:[#allocation2 + $0x30] sm:$0x1] %vm418_vm3, %v2052_v13  ;;  %423 = vst.msk [vmem:[#allocation2 + $0x40] sm:$0x1] %vm418_vm3, %v2052_v13  ;;  %1892 = vmatprep.subr.msk.bf16.mxu1 %vm487_vm4, %v2271_v16  ;;  %v460_v19 = vld [vmem:[%s2475_s3] sm:$0x3] }
  0x40   : > { %426 = vst.msk [vmem:[#allocation2 + $0x70] sm:$0x1] %vm418_vm3, %v2052_v13  ;;  %427 = vst.msk [vmem:[#allocation2 + $0x80] sm:$0x1] %vm418_vm3, %v2052_v13  ;;  %1823 = vmatpush3.bf16.msra.mxu1 %v2277_v17  ;;  %1889 = vmatprep.subr.msk.bf16.mxu0 %vm487_vm4, %v460_v19  ;;  %v1594_v20 = vld [vmem:[%s2474_s2] ss:$0 sm:$0xff] }
  0x41   : > { %430 = vst.msk [vmem:[#allocation2 + $0x19] sm:$0x1] %vm418_vm3, %v2052_v13  ;;  %431 = vst.msk [vmem:[#allocation2 + $0x29] sm:$0x1] %vm418_vm3, %v2052_v13  ;;  %1893 = vmatprep.subr.msk.bf16.mxu1 %vm487_vm4, %v2283_v18  ;;  %v569_v51 = vsel %vm487_vm4, %v460_v19, 0  ;;  %s1981_s11 = scalar_lea.vmem %s2425_s19, 1024 }
  0x42   : > { %432 = vst.msk [vmem:[#allocation2 + $0x39] sm:$0x1] %vm418_vm3, %v2052_v13  ;;  %433 = vst.msk [vmem:[#allocation2 + $0x49] sm:$0x1] %vm418_vm3, %v2052_v13  ;;  %v461_v41 = vld [vmem:[#allocation2 + $0x1] sm:$0xff]  ;;  %p1982_p6 = scmp.ne.s32.totalorder %s2425_s19, %s1981_s11  ;;  %p2486_p11 = scmp.ne.s32.totalorder %s2483_s13, 0 }
  0x43   : > { %434 = vst.msk [vmem:[#allocation2 + $0x59] sm:$0x1] %vm418_vm3, %v2052_v13  ;;  %435 = vst.msk [vmem:[#allocation2 + $0x69] sm:$0x1] %vm418_vm3, %v2052_v13  ;;  %v1609_v52 = vld [vmem:[%s2475_s3 + $0x4] sm:$0x3] }
  0x44   : > { %436 = vst.msk [vmem:[#allocation2 + $0x79] sm:$0x1] %vm418_vm3, %v2052_v13  ;;  %437 = vst.msk [vmem:[#allocation2 + $0x89] sm:$0x1] %vm418_vm3, %v2052_v13  ;;  %v1624_v14 = vld [vmem:[%s2475_s3 + $0xa] sm:$0x3]  ;;  %p1983_p12 = pnand %p1982_p6, %p2486_p11 }
  0x45   : > { %1719 = vmatmul.mubr.msk.bf16.gmra.mrb[4].mxu0 %vm325_vm0, %v309_v12  ;;  %419 = vst.msk [vmem:[#allocation2] sm:$0x1] %vm418_vm3, %v2052_v13  ;;  %428 = vst.msk [vmem:[#allocation2 + $0x90] sm:$0x1] %vm418_vm3, %v2052_v13  ;;  %v867_v12 = vsel %vm487_vm4, %v2283_v18, 0  ;;  %s2053_s18 = smov [#allocation6]  }
  0x46   : > { %429 = vst.msk [vmem:[#allocation2 + $0x9] sm:$0x1] %vm418_vm3, %v2052_v13  ;;  %438 = vst.msk [vmem:[#allocation2 + $0x99] sm:$0x1] %vm418_vm3, %v2052_v13  ;;  %p1984_p13 = pneg %p1983_p12  ;;  %s1985_s15 = sshll.u32 %s2053_s18, 4  ;;  %s1986_s15 = int_to_ptr.vmem [resolvable:$false] %s1985_s15 }
  0x47   : > { %s1987_s20 = scalar_lea.vmem %s1986_s15, 2048  ;;  %p1988_p8 = scmp.lt.s32.totalorder %s2425_s19, %s1986_s15 }
  0x48   : > { %p1989_p10 = scmp.lt.s32.totalorder %s1987_s20, %s1981_s11 }
  0x4a   : > { %p1990_p0 = por %p1989_p10, %p1988_p8 }
  0x4c   : > { %v448_v55 = vld [vmem:[#allocation2] sm:$0xff]  ;;  %p1991_p2 = pnand %p1990_p0, %p1984_p13 }
 0x110   : > { %v1716_v21 = vpop.f32.mrb[0].mxu0 }
 0x111   : > { %v381_v22 = vadd.f32 %v1716_v21, %v1594_v20  ;;  %v372_v23 = vpop.f32.mrb[1].mxu0 }
 0x112   : > { %v373_v24 = vadd.f32 %v1594_v20, %v372_v23  ;;  %v1717_v25 = vpop.f32.mrb[2].mxu0  ;;  %v969_v23 = vsel %vm487_vm4, %v1624_v14, 0 }
 0x113   : > { %v405_v26 = vmax.f32 %v381_v22, 0.0  ;;  %v384_v27 = vadd.f32 %v1717_v25, %v1594_v20  ;;  %v375_v28 = vpop.f32.mrb[3].mxu0  ;;  %v663_v25 = vsel %vm487_vm4, %v1609_v52, 0 }
 0x114   : > { %v403_v29 = vmax.f32 %v373_v24, 0.0  ;;  %v376_v30 = vadd.f32 %v1594_v20, %v375_v28 }
 0x115   : > { %442 = vst.msk [vmem:[#allocation2 + $0x31] sm:$0xff] %vm411_vm1, %v405_v26  ;;  %v406_v31 = vmax.f32 %v384_v27, 0.0  ;;  %v1629_v26 = vld [vmem:[%s2475_s3 + $0xc] sm:$0x3]  ;;  %v636_v27 = vld [vmem:[#allocation2 + $0x2] sm:$0xff] }
 0x116   : > { %440 = vst.msk [vmem:[#allocation2 + $0x11] sm:$0xff] %vm411_vm1, %v403_v29  ;;  %v404_v32 = vmax.f32 %v376_v30, 0.0 }
 0x117   : > { %443 = vst.msk [vmem:[#allocation2 + $0x41] sm:$0xff] %vm411_vm1, %v406_v31 }
 0x118   : > { %441 = vst.msk [vmem:[#allocation2 + $0x21] sm:$0xff] %vm411_vm1, %v404_v32  ;;  %v1720_v33 = vpop.f32.mrb[4].mxu0 }
 0x119   : > { %v397_v34 = vadd.f32 %v1720_v33, %v1594_v20  ;;  %v388_v35 = vpop.f32.mrb[5].mxu0 }
 0x11a   : > { %v389_v36 = vadd.f32 %v1594_v20, %v388_v35  ;;  %v1721_v37 = vpop.f32.mrb[6].mxu0 }
 0x11b   : > { %v409_v38 = vmax.f32 %v397_v34, 0.0  ;;  %v400_v39 = vadd.f32 %v1721_v37, %v1594_v20  ;;  %v391_v40 = vpop.f32.mrb[7].mxu0 }
 0x11c   : > { %v407_v42 = vmax.f32 %v389_v36, 0.0  ;;  %v392_v43 = vadd.f32 %v1594_v20, %v391_v40  ;;  %v464_v49 = vld [vmem:[#allocation2 + $0x31] sm:$0xff] }
 0x11d   : > { %446 = vst.msk [vmem:[#allocation2 + $0x71] sm:$0xff] %vm411_vm1, %v409_v38  ;;  %v410_v44 = vmax.f32 %v400_v39, 0.0  ;;  %v462_v45 = vld [vmem:[#allocation2 + $0x11] sm:$0xff] }
 0x11e   : > { %444 = vst.msk [vmem:[#allocation2 + $0x51] sm:$0xff] %vm411_vm1, %v407_v42  ;;  %v408_v46 = vmax.f32 %v392_v43, 0.0  ;;  %v469_v47 = vpack.c.bf16 %v462_v45, %v461_v41  ;;  %v465_v53 = vld [vmem:[#allocation2 + $0x41] sm:$0xff]  ;;  %v2314_v58 = vld [vmem:[#allocation2 + $0x10] sm:$0xff]  ;;  %v1072_v41 = vsel %vm487_vm4, %v1629_v26, 0 }
 0x11f   : > { %447 = vst.msk [vmem:[#allocation2 + $0x81] sm:$0xff] %vm411_vm1, %v410_v44  ;;  %v463_v48 = vld [vmem:[#allocation2 + $0x21] sm:$0xff]  ;;  %v456_v8 = vpack.c.bf16 %v2314_v58, %v448_v55  ;;  %v451_v18 = vld [vmem:[#allocation2 + $0x30] sm:$0xff]  ;;  %v849_v22 = vpack.c.bf16 %v465_v53, %v464_v49  ;;  %v1634_v43 = vld [vmem:[%s2475_s3 + $0xe] sm:$0x3] }
 0x120   : > { %445 = vst.msk [vmem:[#allocation2 + $0x61] sm:$0xff] %vm411_vm1, %v408_v46  ;;  %1724 = vmatprep.mubr.msk.bf16.mxu0 %vm411_vm1, %v469_v47  ;;  %v2303_v50 = vpack.c.bf16 %v464_v49, %v463_v48  ;;  %v848_v13 = vpack.c.bf16 %v463_v48, %v462_v45  ;;  %v450_v15 = vld [vmem:[#allocation2 + $0x20] sm:$0xff]  ;;  %v637_v28 = vld [vmem:[#allocation2 + $0x12] sm:$0xff] }
 0x121   : > { %v457_v19 = vpack.c.bf16 %v451_v18, %v450_v15  ;;  %v452_v20 = vld [vmem:[#allocation2 + $0x40] sm:$0xff]  ;;  %v644_v32 = vpack.c.bf16 %v637_v28, %v636_v27  ;;  %v639_v37 = vld [vmem:[#allocation2 + $0x32] sm:$0xff]  ;;  %v746_v47 = vpack.c.bf16 %v450_v15, %v2314_v58 }
 0x122   : > { %1725 = vmatmul.mubr.msk.bf16.vlgmr.msra.gmra.mrb[8].mxu0 %vm411_vm1, %v2303_v50  ;;  %v943_v30 = vld [vmem:[#allocation2 + $0x22] sm:$0xff]  ;;  %v747_v49 = vpack.c.bf16 %v452_v20, %v451_v18  ;;  %v1154_v55 = vld [vmem:[#allocation2 + $0x91] sm:$0xff] }
 0x123   : > { %1733 = vmatpush3.bf16.msra.mxu0 %v569_v51  ;;  %v950_v34 = vpack.c.bf16 %v943_v30, %v637_v28  ;;  %v640_v35 = vld [vmem:[#allocation2 + $0x42] sm:$0xff]  ;;  %v645_v39 = vpack.c.bf16 %v639_v37, %v943_v30  ;;  %v1174_v51 = vsel %vm487_vm4, %v1634_v43, 0 }
 0x124   : > { %1890 = vmatprep.subr.msk.bf16.mxu0 %vm487_vm4, %v1609_v52  ;;  %v468_v57 = vld [vmem:[#allocation2 + $0x71] sm:$0xff] }
 0x125   : > { %v466_v54 = vld [vmem:[#allocation2 + $0x51] sm:$0xff] }
 0x126   : > { %v2312_v56 = vpack.c.bf16 %v466_v54, %v465_v53  ;;  %v2316_v59 = vld [vmem:[#allocation2 + $0x80] sm:$0xff]  ;;  %v742_v61 = vld [vmem:[#allocation2 + $0x50] sm:$0xff] }
 0x127   : > { %v467_v60 = vld [vmem:[#allocation2 + $0x61] sm:$0xff]  ;;  %v744_v4 = vld [vmem:[#allocation2 + $0x70] sm:$0xff]  ;;  %v458_v21 = vpack.c.bf16 %v742_v61, %v452_v20 }
 0x128   : > { %v743_v62 = vld [vmem:[#allocation2 + $0x60] sm:$0xff]  ;;  %1728 = vmatprep.mubr.msk.bf16.mxu0 %vm411_vm1, %v2312_v56  ;;  %v2320_v63 = vpack.c.bf16 %v468_v57, %v467_v60  ;;  %v749_v9 = vpack.c.bf16 %v2316_v59, %v744_v4  ;;  %v850_v24 = vpack.c.bf16 %v467_v60, %v466_v54  ;;  %v641_v36 = vld [vmem:[#allocation2 + $0x52] sm:$0xff] }
 0x129   : > { %v748_v0 = vpack.c.bf16 %v743_v62, %v742_v61  ;;  %v847_v29 = vld [vmem:[#allocation2 + $0x81] sm:$0xff]  ;;  %v459_v31 = vpack.c.bf16 %v744_v4, %v743_v62  ;;  %v646_v40 = vpack.c.bf16 %v641_v36, %v640_v35  ;;  %v643_v45 = vld [vmem:[#allocation2 + $0x72] sm:$0xff] }
 0x12a   : > { %1729 = vmatmul.mubr.msk.bf16.gmra.mrb[12].mxu0 %vm411_vm1, %v2320_v63  ;;  %v851_v33 = vpack.c.bf16 %v847_v29, %v468_v57  ;;  %v947_v38 = vld [vmem:[#allocation2 + $0x62] sm:$0xff]  ;;  %v1052_v52 = vld [vmem:[#allocation2 + $0x90] sm:$0xff]  ;;  %v1158_v57 = vpack.c.bf16 %v1154_v55, %v847_v29 }
 0x12b   : > { %1758 = vmatprep.mubr.msk.bf16.mxu1 %vm411_vm1, %v748_v0  ;;  %1734 = vmatprep.mubr.msk.bf16.mxu0 %vm411_vm1, %v456_v8  ;;  %v952_v42 = vpack.c.bf16 %v947_v38, %v641_v36  ;;  %v949_v44 = vld [vmem:[#allocation2 + $0x82] sm:$0xff]  ;;  %v647_v46 = vpack.c.bf16 %v643_v45, %v947_v38  ;;  %v1056_v53 = vpack.c.bf16 %v1052_v52, %v2316_v59 }
 0x12c   : > { %1759 = vmatmul.mubr.msk.bf16.vlgmr.msra.gmra.mrb[0].mxu1 %vm411_vm1, %v749_v9  ;;  %v953_v48 = vpack.c.bf16 %v949_v44, %v643_v45 }
 0x12d   : > { %1763 = vmatpush3.bf16.msra.mxu1 %v867_v12  ;;  %1764 = vmatprep.mubr.msk.bf16.mxu1 %vm411_vm1, %v848_v13  ;;  %v1644_v13 = vld [vmem:[%s2476_s4] ss:$0 sm:$0xff] }
 0x12e   : > { %1894 = vmatprep.subr.msk.bf16.mxu1 %vm487_vm4, %v1624_v14 }
 0x132   : > { %1735 = vmatmul.mubr.msk.bf16.vlgmr.msra.gmra.mrb[8].mxu0 %vm411_vm1, %v457_v19 }
 0x133   : > { %1738 = vmatprep.mubr.msk.bf16.mxu0 %vm411_vm1, %v458_v21  ;;  %1743 = vmatpush3.bf16.msra.mxu0 %v663_v25 }
 0x134   : > { %1765 = vmatmul.mubr.msk.bf16.vlgmr.msra.gmra.mrb[4].mxu1 %vm411_vm1, %v849_v22  ;;  %1891 = vmatprep.subr.msk.bf16.mxu0 %vm487_vm4, %v2271_v16  ;;  %v951_v16 = vpack.c.bf16 %v640_v35, %v639_v37 }
 0x135   : > { %1773 = vmatpush3.bf16.msra.mxu1 %v969_v23  ;;  %1768 = vmatprep.mubr.msk.bf16.mxu1 %vm411_vm1, %v850_v24 }
 0x136   : > { %1895 = vmatprep.subr.msk.bf16.mxu1 %vm487_vm4, %v1629_v26 }
 0x13a   : > { %1739 = vmatmul.mubr.msk.bf16.gmra.mrb[12].mxu0 %vm411_vm1, %v459_v31 }
 0x13b   : > { %1744 = vmatprep.mubr.msk.bf16.mxu0 %vm411_vm1, %v644_v32 }
 0x13c   : > { %1769 = vmatmul.mubr.msk.bf16.gmra.mrb[0].mxu1 %vm411_vm1, %v851_v33 }
 0x13d   : > { %1774 = vmatprep.mubr.msk.bf16.mxu1 %vm411_vm1, %v950_v34 }
 0x142   : > { %1745 = vmatmul.mubr.msk.bf16.vlgmr.msra.gmra.mrb[8].mxu0 %vm411_vm1, %v645_v39 }
 0x143   : > { %1748 = vmatprep.mubr.msk.bf16.mxu0 %vm411_vm1, %v646_v40  ;;  %1753 = vmatpush3.bf16.msra.mxu0 %v2277_v17  ;;  %v1639_v17 = vld [vmem:[%s2475_s3 + $0x10] sm:$0x3] }
 0x144   : > { %1775 = vmatmul.mubr.msk.bf16.vlgmr.msra.gmra.mrb[4].mxu1 %vm411_vm1, %v951_v16  ;;  %v1276_v54 = vsel %vm487_vm4, %v1639_v17, 0 }
 0x145   : > { %1783 = vmatpush3.bf16.msra.mxu1 %v1072_v41  ;;  %1778 = vmatprep.mubr.msk.bf16.mxu1 %vm411_vm1, %v952_v42 }
 0x146   : > { %1896 = vmatprep.subr.msk.bf16.mxu1 %vm487_vm4, %v1634_v43 }
 0x14a   : > { %1749 = vmatmul.mubr.msk.bf16.gmra.mrb[12].mxu0 %vm411_vm1, %v647_v46 }
 0x14b   : > { %1754 = vmatprep.mubr.msk.bf16.mxu0 %vm411_vm1, %v746_v47 }
 0x14c   : > { %1779 = vmatmul.mubr.msk.bf16.gmra.mrb[0].mxu1 %vm411_vm1, %v953_v48 }
 0x14d   : > { %1784 = vmatprep.mubr.msk.bf16.mxu1 %vm411_vm1, %v457_v19 }
 0x152   : > { %1755 = vmatmul.mubr.msk.bf16.vlgmr.msra.gmra.mrb[8].mxu0 %vm411_vm1, %v747_v49 }
 0x154   : > { %1785 = vmatmul.mubr.msk.bf16.vlgmr.msra.gmra.mrb[4].mxu1 %vm411_vm1, %v458_v21 }
 0x155   : > { %1793 = vmatpush3.bf16.msra.mxu1 %v1174_v51  ;;  %1788 = vmatprep.mubr.msk.bf16.mxu1 %vm411_vm1, %v459_v31  ;;  %v1645_v51 = vld [vmem:[%s2478_s6] ss:$0 sm:$0xff] }
 0x156   : > { %1897 = vmatprep.subr.msk.bf16.mxu1 %vm487_vm4, %v1639_v17 }
 0x15c   : > { %1789 = vmatmul.mubr.msk.bf16.gmra.mrb[0].mxu1 %vm411_vm1, %v1056_v53 }
 0x15d   : > { %1794 = vmatprep.mubr.msk.bf16.mxu1 %vm411_vm1, %v2303_v50  ;;  %v1256_v50 = vld [vmem:[#allocation2 + $0x92] sm:$0xff] }
 0x15e   : > { %v1260_v58 = vpack.c.bf16 %v1256_v50, %v949_v44 }
 0x164   : > { %1795 = vmatmul.mubr.msk.bf16.vlgmr.msra.gmra.mrb[4].mxu1 %vm411_vm1, %v2312_v56  ;;  %v1378_v56 = vld [vmem:[%s2477_s5] sm:$0x3] }
 0x165   : > { %1803 = vmatpush3.bf16.msra.mxu1 %v1276_v54  ;;  %1798 = vmatprep.mubr.msk.bf16.mxu1 %vm411_vm1, %v2320_v63  ;;  %v1399_v59 = vsel %vm487_vm4, %v1378_v56, 0 }
 0x166   : > { %1898 = vmatprep.subr.msk.bf16.mxu0 %vm487_vm4, %v1378_v56 }
 0x167   : > { %1813 = vmatpush3.bf16.msra.mxu0 %v1399_v59 }
 0x16c   : > { %1799 = vmatmul.mubr.msk.bf16.gmra.mrb[0].mxu1 %vm411_vm1, %v1158_v57 }
 0x16d   : > { %1804 = vmatprep.mubr.msk.bf16.mxu1 %vm411_vm1, %v645_v39 }
 0x174   : > { %1805 = vmatmul.mubr.msk.bf16.vlgmr.msra.gmra.mrb[4].mxu1 %vm411_vm1, %v646_v40 }
 0x175   : > { %1808 = vmatprep.mubr.msk.bf16.mxu1 %vm411_vm1, %v647_v46 }
 0x17c   : > { %1809 = vmatmul.mubr.msk.bf16.gmra.mrb[0].mxu1 %vm411_vm1, %v1260_v58 }
 0x21d   : > { %v1750_v60 = vpop.f32.mrb[12].mxu0 }
 0x21e   : > { %v715_v61 = vpop.f32.mrb[13].mxu0 }
 0x21f   : > { %v1751_v62 = vpop.f32.mrb[14].mxu0 }
 0x220   : > { %v718_v63 = vpop.f32.mrb[15].mxu0 }
 0x225   : > { %v1756_v0 = vpop.f32.mrb[8].mxu0 }
 0x226   : > { %v801_v4 = vpop.f32.mrb[9].mxu0 }
 0x227   : > { %v1757_v8 = vpop.f32.mrb[10].mxu0 }
 0x228   : > { %v804_v9 = vpop.f32.mrb[11].mxu0 }
 0x247   : > { %v1806_v12 = vpop.f32.mrb[4].mxu1 }
 0x248   : > { %v1824_v14 = vadd.f32 %v1806_v12, %v1756_v0  ;;  %v1312_v15 = vpop.f32.mrb[5].mxu1 }
 0x249   : > { %v1825_v18 = vadd.f32 %v1312_v15, %v801_v4  ;;  %v1807_v19 = vpop.f32.mrb[6].mxu1 }
 0x24a   : > { %v1360_v20 = vadd.f32 %v1824_v14, %v1644_v13  ;;  %v1826_v21 = vadd.f32 %v1807_v19, %v1757_v8  ;;  %v1315_v22 = vpop.f32.mrb[7].mxu1 }
 0x24b   : > { %v1358_v23 = vadd.f32 %v1825_v18, %v1644_v13  ;;  %v1827_v24 = vadd.f32 %v1315_v22, %v804_v9 }
 0x24c   : > { %v1361_v25 = vadd.f32 %v1826_v21, %v1644_v13  ;;  %v1368_v27 = vmax.f32 %v1360_v20, 0.0 }
 0x24d   : > { %v1359_v26 = vadd.f32 %v1827_v24, %v1644_v13  ;;  %v1366_v29 = vmax.f32 %v1358_v23, 0.0 }
 0x24e   : > { %v1369_v28 = vmax.f32 %v1361_v25, 0.0 }
 0x24f   : > { %v1367_v30 = vmax.f32 %v1359_v26, 0.0  ;;  %v1810_v31 = vpop.f32.mrb[0].mxu1 }
 0x250   : > { %v1375_v32 = vpack.c.bf16 %v1369_v28, %v1368_v27  ;;  %v1828_v33 = vadd.f32 %v1810_v31, %v1750_v60  ;;  %v1328_v34 = vpop.f32.mrb[1].mxu1 }
 0x251   : > { %v1374_v35 = vpack.c.bf16 %v1367_v30, %v1366_v29  ;;  %v1829_v36 = vadd.f32 %v1328_v34, %v715_v61  ;;  %v1811_v37 = vpop.f32.mrb[2].mxu1 }
 0x252   : > { %v1364_v38 = vadd.f32 %v1828_v33, %v1644_v13  ;;  %v1830_v39 = vadd.f32 %v1811_v37, %v1751_v62  ;;  %v1331_v40 = vpop.f32.mrb[3].mxu1 }
 0x253   : > { %v1362_v16 = vadd.f32 %v1829_v36, %v1644_v13  ;;  %v1831_v41 = vadd.f32 %v1331_v40, %v718_v63  ;;  %1814 = vmatprep.mubr.msk.bf16.mxu0 %vm411_vm1, %v1374_v35 }
 0x254   : > { %v1365_v42 = vadd.f32 %v1830_v39, %v1644_v13  ;;  %1815 = vmatmul.mubr.msk.bf16.vlgmr.msra.gmra.mrb[16].mxu0 %vm411_vm1, %v1375_v32  ;;  %v1372_v44 = vmax.f32 %v1364_v38, 0.0 }
 0x255   : > { %v1363_v43 = vadd.f32 %v1831_v41, %v1644_v13  ;;  %v1370_v46 = vmax.f32 %v1362_v16, 0.0 }
 0x256   : > { %v1373_v45 = vmax.f32 %v1365_v42, 0.0 }
 0x257   : > { %v1371_v47 = vmax.f32 %v1363_v43, 0.0 }
 0x258   : > { %v1377_v48 = vpack.c.bf16 %v1373_v45, %v1372_v44 }
 0x259   : > { %v1376_v49 = vpack.c.bf16 %v1371_v47, %v1370_v46 }
 0x25b   : > { %1818 = vmatprep.mubr.msk.bf16.mxu0 %vm411_vm1, %v1376_v49 }
 0x25c   : > { %1819 = vmatmul.mubr.msk.bf16.gmra.mrb[20].mxu0 %vm411_vm1, %v1377_v48 }
 0x327   : > { %v1816_v17 = vpop.f32.mrb[16].mxu0 }
 0x328   : > { %v1444_v52 = vadd.f32 %v1816_v17, %v1645_v51  ;;  %v1435_v53 = vpop.f32.mrb[17].mxu0 }
 0x329   : > { %v1436_v54 = vadd.f32 %v1645_v51, %v1435_v53  ;;  %v1817_v55 = vpop.f32.mrb[18].mxu0 }
 0x32a   : > { %v1476_v57 = vadd.f32 %v1444_v52, %v2217_v3  ;;  %v1447_v50 = vadd.f32 %v1817_v55, %v1645_v51  ;;  %v1438_v58 = vpop.f32.mrb[19].mxu0 }
 0x32b   : > { %v1474_v56 = vadd.f32 %v1436_v54, %v2213_v1  ;;  %v1439_v59 = vadd.f32 %v1645_v51, %v1438_v58 }
 0x32c   : > { %v1484_v60 = vmax.f32 %v1476_v57, 0.0  ;;  %v1477_v61 = vadd.f32 %v1447_v50, %v2221_v5 }
 0x32d   : > { %v1482_v62 = vmax.f32 %v1474_v56, 0.0  ;;  %v1475_v63 = vadd.f32 %v1439_v59, %v2215_v2 }
 0x32e   : > { %1492 = vst.msk [vmem:[%s296_s29 + $0x10] sm:$0xff] %vm325_vm0, %v1484_v60  ;;  %v1485_v0 = vmax.f32 %v1477_v61, 0.0 }
 0x32f   : > { %1490 = vst.msk [vmem:[%s296_s29] sm:$0xff] %vm325_vm0, %v1482_v62  ;;  %v1483_v3 = vmax.f32 %v1475_v63, 0.0  ;;  %v1820_v4 = vpop.f32.mrb[20].mxu0 }
 0x330   : > { %1493 = vst.msk [vmem:[%s296_s29 + $0x18] sm:$0xff] %vm325_vm0, %v1485_v0  ;;  %v1460_v1 = vadd.f32 %v1820_v4, %v1645_v51  ;;  %v1451_v8 = vpop.f32.mrb[21].mxu0 }
 0x331   : > { %1491 = vst.msk [vmem:[%s296_s29 + $0x8] sm:$0xff] %vm325_vm0, %v1483_v3  ;;  %v1452_v5 = vadd.f32 %v1645_v51, %v1451_v8  ;;  %v1821_v9 = vpop.f32.mrb[22].mxu0 }
 0x332   : > { %v1480_v2 = vadd.f32 %v1460_v1, %v2234_v10  ;;  %v1463_v12 = vadd.f32 %v1821_v9, %v1645_v51  ;;  %v1454_v13 = vpop.f32.mrb[23].mxu0 }
 0x333   : > { %v1478_v14 = vadd.f32 %v1452_v5, %v2223_v6  ;;  %v1455_v15 = vadd.f32 %v1645_v51, %v1454_v13 }
 0x334   : > { %v1488_v18 = vmax.f32 %v1480_v2, 0.0  ;;  %v1481_v19 = vadd.f32 %v1463_v12, %v2236_v11 }
 0x335   : > { %v1486_v20 = vmax.f32 %v1478_v14, 0.0  ;;  %v1479_v21 = vadd.f32 %v1455_v15, %v2225_v7 }
 0x336   : > { %1496 = vst.msk [vmem:[%s296_s29 + $0x30] sm:$0xff] %vm325_vm0, %v1488_v18  ;;  %v1489_v22 = vmax.f32 %v1481_v19, 0.0 }
 0x337   : > { %1494 = vst.msk [vmem:[%s296_s29 + $0x20] sm:$0xff] %vm325_vm0, %v1486_v20  ;;  %v1487_v6 = vmax.f32 %v1479_v21, 0.0 }
 0x338   : > { %1497 = vst.msk [vmem:[%s296_s29 + $0x38] sm:$0xff] %vm325_vm0, %v1489_v22 }
 0x339   : > { %1495 = vst.msk [vmem:[%s296_s29 + $0x28] sm:$0xff] %vm325_vm0, %v1487_v6 }
 0x33a   : > { %1994 = shalt.err (!%p1991_p2)
}
 0x33b   : > { %s1995_s22 = scalar_lea.hbm %s2423_s8, 1024  ;;  %s1999_s29 = scalar_lea.hbm %s2479_s7, 2048 }
 0x33c   : > { %p1996_p4 = scmp.ne.s32.totalorder %s2423_s8, %s1995_s22  ;;  %p2000_p9 = scmp.lt.u32.totalorder %s2423_s8, %s2479_s7 }
 0x33d   : > { %p2001_p1 = scmp.lt.u32.totalorder %s1999_s29, %s1995_s22  ;;  %p2003_p6 = scmp.lt.u32.totalorder %s1995_s22, %s2423_s8 }
 0x33e   : > { %p1997_p5 = pnand %p1996_p4, %p2486_p11 }
 0x33f   : > { %p2002_p3 = por %p2001_p1, %p2000_p9 }
 0x340   : > { %p1998_p7 = pneg %p1997_p5 }
 0x341   : > { %p2004_p12 = por %p2003_p6, %p2002_p3 }
 0x343   : > { %p2005_p13 = pnand %p2004_p12, %p1998_p7 }
 0x345   : > { %2008 = shalt.err (!%p2005_p13)
}
 0x346   : > { %s2054_s9 = smov 128   ;;  %s2055_s11 = smov 8  }
 0x347   : > { %1901 = dma.vmem_to_hbm [thread:$0]  (%p2486_p11), %s2425_s19, 1024, %s2423_s8, %s1499_s28, %s2054_s9, %s2054_s9, %s2055_s11  }
 0x348 PF: > { %s1527_s18 = sand.u32 1, %s2035_s24   ;;  %p2487_p8 = scmp.ne.s32.totalorder %s2484_s14, 0 }
 0x349   : > { %p2488_p10 = scmp.ge.s32.totalorder %s2047_s27, 2  ;;  %s1528_s15 = scalar_lea.sflag [#allocation5], %s1527_s18 }
 0x34b   : > { %p1908_p0 = pnand %p2488_p10, %p2487_p8 }
 0x34d   : > { %2030 = dma.done.wait (!%p1908_p0), %s1528_s15, 1024  }
 0x34e   : > { %2032 = vsyncadd (!%p1908_p0), %s1528_s15, 4294966272  ;;  %p20_p2 = scmp.ge.s32.totalorder %s2121_s30, 4   ;;  %s2489_s24 = smov %s2039_s25 }
 0x34f   : > { %s2490_s25 = smov %s2043_s26  ;;  %s2491_s26 = smov %s2133_s10 }
 0x350   : > { %s2492_s27 = smov %s2121_s30  ;;  %22 = sbr.rel (!%p20_p2) target bundleno = 5 (0x5), region = 104 }
 0x357   :  { %1533 = vsyncpa [#allocation4], 1 }
 0x358   :  { %1535 = vsyncpa [#allocation4 + $0x1], 1 }
 0x359   :  { %1536 = vsyncpa [#allocation5], 1 }
 0x35a   :  { %1538 = vsyncpa [#allocation5 + $0x1], 1 }

</bundles_post_ra>
